<compile_context>
chip_gen: v6e
topology: v6e:2x2x1
jax: 0.10.0
libtpu: 0.0.40
codegen_flags: <defaults>
</compile_context>

<pallas_src>
import jax
import jax.numpy as jnp
from jax.experimental import pallas as pl
from jax.experimental.pallas import tpu as pltpu


def _round_up(x, m):
    return ((x + m - 1) // m) * m


def _vmem_limit_bytes():
    """~85% of physical VMEM (v5e/v6e ~108 MiB, v7x ~54 MiB); safe fallback."""
    cap = 64 * 1024 * 1024
    try:
        info = pltpu.get_tpu_info()
        cap = int(getattr(info, "vmem_capacity_bytes", cap) or cap)
    except Exception:
        pass  # no TPU visible at trace time / older jax: conservative default
    return int(0.85 * cap)


def _resident_spec(shape):
    """BlockSpec for an operand that is identical across all grid steps."""
    try:
        # Single-buffer resident weights/biases (they never change across steps).
        return pl.BlockSpec(shape, lambda i: (0, 0), pipeline_mode=pl.Buffered(1))
    except TypeError:
        # Older jax without pipeline_mode: fall back to default double-buffering.
        return pl.BlockSpec(shape, lambda i: (0, 0))


def res_layer_kernel(x_ref, w1_ref, b1_ref, w2_ref, b2_ref, o_ref):
    """One [row_tile, Dp] tile: y = relu(relu(x @ W1t + b1) @ W2t + b2) + x."""
    x = x_ref[...]                                   # native dtype -> bf16 MXU fast path
    # Linear 1 + bias + ReLU (f32 accumulate, bias/ReLU fused on the accumulator).
    h = jnp.dot(x, w1_ref[...], preferred_element_type=jnp.float32)
    h = jnp.maximum(h + b1_ref[...], 0.0)
    # Linear 2 + bias + ReLU (cast back to weight dtype to keep bf16 MXU throughput).
    h = jnp.dot(h.astype(w2_ref.dtype), w2_ref[...], preferred_element_type=jnp.float32)
    h = jnp.maximum(h + b2_ref[...], 0.0)
    # Residual add in f32, single downcast at the store.
    o_ref[...] = (h + x.astype(jnp.float32)).astype(o_ref.dtype)


def prepare_res_layer_params(w1, b1, w2, b2, *, param_dtype=None):
    """Transpose + lane-dense pad the weights ONCE (cache / reuse across calls).

    w1, w2 : [D, D] in PyTorch [out, in] layout; b1, b2 : [D].
    """
    D = w1.shape[0]
    assert w1.shape == (D, D) and w2.shape == (D, D) and b1.shape == (D,) \
        and b2.shape == (D,), "ResLayer residual requires in_dim == out_dim"
    Dp = max(128, _round_up(D, 128))
    w_dtype = jnp.dtype(param_dtype) if param_dtype is not None else w1.dtype
    # Padded columns of W^T and padded bias entries are exactly zero, so padded
    # output lanes stay zero through both stages and the residual.
    w1_t = jnp.zeros((Dp, Dp), w_dtype).at[:D, :D].set(w1.T.astype(w_dtype))
    w2_t = jnp.zeros((Dp, Dp), w_dtype).at[:D, :D].set(w2.T.astype(w_dtype))
    b1_p = jnp.zeros((1, Dp), jnp.float32).at[0, :D].set(b1.astype(jnp.float32))
    b2_p = jnp.zeros((1, Dp), jnp.float32).at[0, :D].set(b2.astype(jnp.float32))
    return {"w1_t": w1_t, "b1_p": b1_p, "w2_t": w2_t, "b2_p": b2_p,
            "D": D, "Dp": Dp}


def _select_row_tile(N, Dp, x_itemsize, out_itemsize, w_itemsize,
                     vmem_limit_bytes, requested=None):
    """Pick an 8-aligned row tile that fills the MXU but fits the VMEM budget."""
    budget = int(0.85 * vmem_limit_bytes)
    # Resident operands: W1^T + W2^T (single-buffered via Buffered(1)) + 2 f32 biases.
    resident = 2 * Dp * Dp * w_itemsize + 2 * Dp * 4
    if resident > budget:
        raise ValueError(
            "resident DxD weights exceed the VMEM budget: use bf16/fp8 weights, "
            "raise vmem_limit_bytes, or add a K-tiling grid axis (see TODO)")
    # Per-row-of-tile bytes: x + out double-buffered, plus ~3 f32 intermediates
    # (h accumulator, its downcast copy, x upcast for the residual).
    per_row = 2 * Dp * (x_itemsize + out_itemsize) + 3 * Dp * 4
    rt_cap = max(8, ((budget - resident) // per_row) // 8 * 8)

    if requested is None:
        # Small Dp -> per-step-overhead / x-DMA bound: go big.  Large Dp -> the
        # rt*Dp f32 intermediates + resident weights squeeze VMEM: stay at 256
        # (a multiple of the 256x256 MXU height on v6e/v7x).
        rt = 512 if Dp <= 512 else 256
    else:
        rt = requested
    rt = min(rt, rt_cap)
    rt = min(rt, _round_up(N, 8))           # don't tile past the data
    rt = max(8, (rt // 8) * 8)

    # v7x shards the ("parallel",) row axis across its 2 TensorCores: guarantee
    # at least 2 grid steps whenever the data can be split, so no core idles.
    if N > 8 and _round_up(N, rt) // rt < 2:
        rt = max(8, _round_up((N + 1) // 2, 8))
    return rt


def res_layer_apply(x, params, *, row_tile=None, vmem_limit_bytes=None,
                    matmul_dtype=None):
    """ResLayer forward using pre-padded/transposed params from prepare_res_layer_params.

    x : [..., D]; output dtype matches x.  matmul_dtype=jnp.bfloat16 casts the
    MXU operands (x + weights) to bf16 (f32 accumulate stays in-kernel) — the
    recommended fast path on v5e.
    """
    D, Dp = params["D"], params["Dp"]
    w1_t, b1_p = params["w1_t"], params["b1_p"]
    w2_t, b2_p = params["w2_t"], params["b2_p"]

    orig_shape = x.shape
    assert orig_shape[-1] == D
    out_dtype = x.dtype

    if matmul_dtype is not None:
        x = x.astype(matmul_dtype)
        w1_t = w1_t.astype(matmul_dtype)
        w2_t = w2_t.astype(matmul_dtype)

    x2 = x.reshape(-1, D)
    N = x2.shape[0]

    if vmem_limit_bytes is None:
        vmem_limit_bytes = _vmem_limit_bytes()

    rt = _select_row_tile(N, Dp, x2.dtype.itemsize, jnp.dtype(out_dtype).itemsize,
                          w1_t.dtype.itemsize, vmem_limit_bytes, requested=row_tile)
    Np = _round_up(N, rt)
    grid = (Np // rt,)

    # Skip the pad copy entirely on the aligned fast path.
    aligned = (Np == N) and (Dp == D)
    x_p = x2 if aligned else jnp.zeros((Np, Dp), x2.dtype).at[:N, :D].set(x2)

    flops = 2 * 2 * Np * Dp * Dp
    bytes_accessed = (Np * Dp * x_p.dtype.itemsize                 # x in
                      + Np * Dp * jnp.dtype(out_dtype).itemsize    # out
                      + 2 * Dp * Dp * w1_t.dtype.itemsize          # both weights
                      + 2 * Dp * 4)                                # biases (f32)
    cost = pl.CostEstimate(flops=flops, transcendentals=0,
                           bytes_accessed=bytes_accessed)

    out = pl.pallas_call(
        res_layer_kernel,
        out_shape=jax.ShapeDtypeStruct((Np, Dp), out_dtype),
        grid_spec=pltpu.PrefetchScalarGridSpec(
            num_scalar_prefetch=0,
            grid=grid,
            in_specs=[
                pl.BlockSpec((rt, Dp), lambda i: (i, 0)),   # x tile (pipelined)
                _resident_spec((Dp, Dp)),                   # W1^T (resident, 1 buffer)
                _resident_spec((1, Dp)),                    # b1
                _resident_spec((Dp, Dp)),                   # W2^T (resident, 1 buffer)
                _resident_spec((1, Dp)),                    # b2
            ],
            out_specs=pl.BlockSpec((rt, Dp), lambda i: (i, 0)),
        ),
        compiler_params=pltpu.CompilerParams(
            dimension_semantics=("parallel",),   # row tiles shard across TCs on v7x
            vmem_limit_bytes=vmem_limit_bytes,
        ),
        cost_estimate=cost,
    )(x_p, w1_t, b1_p, w2_t, b2_p)

    if aligned:
        return out.reshape(orig_shape)
    return out[:N, :D].reshape(orig_shape)


def res_layer(x, w1, b1, w2, b2, *, row_tile=None, vmem_limit_bytes=None,
              matmul_dtype=None):
    """Convenience one-shot wrapper (prefer prepare_res_layer_params + res_layer_apply
    when calling repeatedly, so the weight transpose/pad is paid once)."""
    params = prepare_res_layer_params(w1, b1, w2, b2, param_dtype=matmul_dtype)
    return res_layer_apply(x, params, row_tile=row_tile,
                           vmem_limit_bytes=vmem_limit_bytes,
                           matmul_dtype=matmul_dtype)


def reference(x, w1, b1, w2, b2):
    h = jnp.maximum(x @ w1.T + b1, 0.0)
    h = jnp.maximum(h @ w2.T + b2, 0.0)
    return h + x


if __name__ == "__main__":
    # Module-consistent small shapes: batch=4, seq=8, hidden (in_dim == out_dim) = 32.
    B, S, D = 4, 8, 32
    key = jax.random.PRNGKey(0)
    kx, kw1, kb1, kw2, kb2 = jax.random.split(key, 5)

    x = jax.random.normal(kx, (B, S, D), dtype=jnp.float32)
    bound = 1.0 / (D ** 0.5)
    w1 = jax.random.uniform(kw1, (D, D), minval=-bound, maxval=bound, dtype=jnp.float32)
    b1 = jax.random.uniform(kb1, (D,), minval=-bound, maxval=bound, dtype=jnp.float32)
    w2 = jax.random.uniform(kw2, (D, D), minval=-bound, maxval=bound, dtype=jnp.float32)
    b2 = jax.random.uniform(kb2, (D,), minval=-bound, maxval=bound, dtype=jnp.float32)

    ref = reference(x, w1, b1, w2, b2)

    # Exact f32 path: params prepared once and reused (hoisted transpose/pad).
    params = prepare_res_layer_params(w1, b1, w2, b2)
    out = jax.block_until_ready(res_layer_apply(x, params))
    assert out.shape == x.shape
    assert jnp.allclose(out, ref, atol=1e-5, rtol=1e-5), "f32 mismatch vs reference"

    # bf16 MXU fast path (recommended on v5e): bf16 operands, f32 accumulate in-kernel,
    # output stays f32.
    params_bf16 = prepare_res_layer_params(w1, b1, w2, b2, param_dtype=jnp.bfloat16)
    out_bf16 = jax.block_until_ready(
        res_layer_apply(x, params_bf16, matmul_dtype=jnp.bfloat16))
    assert out_bf16.dtype == x.dtype
    assert jnp.allclose(out_bf16, ref, atol=5e-2, rtol=5e-2), "bf16 mismatch vs reference"

    # Convenience one-shot wrapper.
    out2 = jax.block_until_ready(res_layer(x, w1, b1, w2, b2))
    assert jnp.allclose(out2, ref, atol=1e-5, rtol=1e-5), "wrapper mismatch vs reference"

    print("KERNEL_OK")
</pallas_src>

<mosaic_0001>
module attributes {stable_mosaic.version = 11 : i64} {
  func.func @res_layer_kernel(%arg0: i32, %arg1: memref<16x128xf32, #tpu.memory_space<vmem>>, %arg2: memref<128x128xf32, #tpu.memory_space<vmem>>, %arg3: memref<1x128xf32, #tpu.memory_space<vmem>>, %arg4: memref<128x128xf32, #tpu.memory_space<vmem>>, %arg5: memref<1x128xf32, #tpu.memory_space<vmem>>, %arg6: memref<16x128xf32, #tpu.memory_space<vmem>>) attributes {dimension_semantics = [#tpu.dimension_semantics<parallel>], iteration_bounds = array<i64: 2>, scalar_prefetch = 0 : i64, scratch_operands = 0 : i64, tpu.core_type = #tpu.core_type<tc>, window_params = [{transform_indices = @transform_0, window_bounds = array<i64: 16, 128>}, {pipeline_mode = #tpu.pipeline_mode<synchronous>, transform_indices = @transform_1, window_bounds = array<i64: 128, 128>}, {pipeline_mode = #tpu.pipeline_mode<synchronous>, transform_indices = @transform_2, window_bounds = array<i64: 1, 128>}, {pipeline_mode = #tpu.pipeline_mode<synchronous>, transform_indices = @transform_3, window_bounds = array<i64: 128, 128>}, {pipeline_mode = #tpu.pipeline_mode<synchronous>, transform_indices = @transform_4, window_bounds = array<i64: 1, 128>}, {transform_indices = @transform_5, window_bounds = array<i64: 16, 128>}]} {
    %c0 = arith.constant 0 : index
    %c0_0 = arith.constant 0 : index
    %0 = vector.load %arg1[%c0, %c0_0] : memref<16x128xf32, #tpu.memory_space<vmem>>, vector<16x128xf32>
    %c0_1 = arith.constant 0 : index
    %c0_2 = arith.constant 0 : index
    %1 = vector.load %arg2[%c0_1, %c0_2] : memref<128x128xf32, #tpu.memory_space<vmem>>, vector<128x128xf32>
    %cst = arith.constant dense<0.000000e+00> : vector<16x128xf32>
    %2 = tpu.matmul %0, %1, %cst {dimension_numbers = #tpu.dot_dimension_numbers<[1], [0], [0], [1], [0, 0, 1, 1], [], []>} : vector<16x128xf32>, vector<128x128xf32>, vector<16x128xf32> -> vector<16x128xf32>
    %c0_3 = arith.constant 0 : index
    %c0_4 = arith.constant 0 : index
    %3 = vector.load %arg3[%c0_3, %c0_4] : memref<1x128xf32, #tpu.memory_space<vmem>>, vector<1x128xf32>
    %4 = vector.broadcast %3 : vector<1x128xf32> to vector<16x128xf32>
    %5 = arith.addf %2, %4 : vector<16x128xf32>
    %cst_5 = arith.constant 0.000000e+00 : f32
    %6 = vector.broadcast %cst_5 : f32 to vector<16x128xf32>
    %7 = arith.maximumf %5, %6 : vector<16x128xf32>
    %c0_6 = arith.constant 0 : index
    %c0_7 = arith.constant 0 : index
    %8 = vector.load %arg4[%c0_6, %c0_7] : memref<128x128xf32, #tpu.memory_space<vmem>>, vector<128x128xf32>
    %cst_8 = arith.constant dense<0.000000e+00> : vector<16x128xf32>
    %9 = tpu.matmul %7, %8, %cst_8 {dimension_numbers = #tpu.dot_dimension_numbers<[1], [0], [0], [1], [0, 0, 1, 1], [], []>} : vector<16x128xf32>, vector<128x128xf32>, vector<16x128xf32> -> vector<16x128xf32>
    %c0_9 = arith.constant 0 : index
    %c0_10 = arith.constant 0 : index
    %10 = vector.load %arg5[%c0_9, %c0_10] : memref<1x128xf32, #tpu.memory_space<vmem>>, vector<1x128xf32>
    %11 = vector.broadcast %10 : vector<1x128xf32> to vector<16x128xf32>
    %12 = arith.addf %9, %11 : vector<16x128xf32>
    %cst_11 = arith.constant 0.000000e+00 : f32
    %13 = vector.broadcast %cst_11 : f32 to vector<16x128xf32>
    %14 = arith.maximumf %12, %13 : vector<16x128xf32>
    %15 = arith.addf %14, %0 : vector<16x128xf32>
    %c0_12 = arith.constant 0 : index
    %c0_13 = arith.constant 0 : index
    %16 = vector.load %arg6[%c0_12, %c0_13] : memref<16x128xf32, #tpu.memory_space<vmem>>, vector<16x128xf32>
    tpu.vector_store %arg6[%c0_12, %c0_13], %15 {strides = array<i32>} : memref<16x128xf32, #tpu.memory_space<vmem>>, vector<16x128xf32>,
    return
  }
  func.func @transform_0(%arg0: i32) -> (i32, i32) {
    %c0_i32 = arith.constant 0 : i32
    %c0_i32_0 = arith.constant 0 : i32
    return %arg0, %c0_i32 : i32, i32
  }
  func.func @transform_1(%arg0: i32) -> (i32, i32) {
    %c0_i32 = arith.constant 0 : i32
    %c0_i32_0 = arith.constant 0 : i32
    %c0_i32_1 = arith.constant 0 : i32
    return %c0_i32, %c0_i32_0 : i32, i32
  }
  func.func @transform_2(%arg0: i32) -> (i32, i32) {
    %c0_i32 = arith.constant 0 : i32
    %c0_i32_0 = arith.constant 0 : i32
    %c0_i32_1 = arith.constant 0 : i32
    return %c0_i32, %c0_i32_0 : i32, i32
  }
  func.func @transform_3(%arg0: i32) -> (i32, i32) {
    %c0_i32 = arith.constant 0 : i32
    %c0_i32_0 = arith.constant 0 : i32
    %c0_i32_1 = arith.constant 0 : i32
    return %c0_i32, %c0_i32_0 : i32, i32
  }
  func.func @transform_4(%arg0: i32) -> (i32, i32) {
    %c0_i32 = arith.constant 0 : i32
    %c0_i32_0 = arith.constant 0 : i32
    %c0_i32_1 = arith.constant 0 : i32
    return %c0_i32, %c0_i32_0 : i32, i32
  }
  func.func @transform_5(%arg0: i32) -> (i32, i32) {
    %c0_i32 = arith.constant 0 : i32
    %c0_i32_0 = arith.constant 0 : i32
    return %arg0, %c0_i32 : i32, i32
  }
}

</mosaic_0001>

<bundles_post_ra>
// kernel: tpu_custom_call.1
= control target key start
LH: loop header
LB: loop body
LE: loop exit
PB: predicated region body
PF: predicated region fallthrough
CT: control target
= control target key end

     0   :  { %10 = vsyncpa [#allocation3], 0  ;;  %s1188_s0 = inlined_call_operand.hbm [shape: f32[32,128], index: 0, kind: input, shape index: {}]   ;;  %s1189_s1 = inlined_call_operand.hbm [shape: f32[128,128], index: 1, kind: input, shape index: {}]   ;;  %s1190_s2 = inlined_call_operand.vmem [shape: f32[1,128], index: 2, kind: input, shape index: {}]   ;;  %s1191_s3 = inlined_call_operand.hbm [shape: f32[128,128], index: 3, kind: input, shape index: {}]   ;;  %s1192_s4 = inlined_call_operand.vmem [shape: f32[1,128], index: 4, kind: input, shape index: {}]   ;;  %s1193_s5 = inlined_call_operand.hbm [shape: f32[32,128], index: 5, kind: output, shape index: {}]  }
   0x1   :  { %12 = vsyncpa [#allocation3 + $0x1], 0 }
   0x2   :  { %13 = vsyncpa [#allocation6], 0 }
   0x3   :  { %14 = vsyncpa [#allocation4], 0 }
   0x4   :  { %16 = vsyncpa [#allocation4 + $0x1], 0  ;;  %s973_s18 = smov 0   ;;  %s975_s19 = smov 0  }
   0x5   :  { %s977_s20 = smov 0   ;;  %s979_s21 = smov 0  }
   0x6 LB: > { %s994_s22 = sadd.s32 4294967295, %s933_s21   ;;  %s586_s23 = sadd.s32 4294967294, %s933_s21   ;;  %s933_s21 = sphi %s979_s21, %s1216_s21   ;;  %s929_s20 = sphi %s977_s20, %s1215_s20   ;;  %s925_s19 = sphi %s975_s19, %s1214_s19   ;;  %s921_s18 = sphi %s973_s18, %s1213_s18  }
   0x7   : > { %p42_p0 = scmp.ne.s32.totalorder %s925_s19, %s921_s18  ;;  %p1194_p1 = scmp.eq.s32.totalorder %s994_s22, 0 }
   0x8   : > { %p150_p2 = scmp.eq.s32.totalorder %s994_s22, 1  ;;  %p156_p3 = scmp.eq.s32.totalorder %s586_s23, 1 }
   0x9   : > { %p1003_p4 = por %p1194_p1, %p42_p0  ;;  %p587_p5 = scmp.ge.s32.totalorder %s933_s21, 1 }
   0xa   : > { %p1008_p6 = por %p156_p3, %p42_p0  ;;  %p163_p7 = scmp.lt.s32.totalorder %s933_s21, 3 }
   0xb   : > { %s1199_s24 = scalar_select %p1003_p4, 1, 0 }
   0xc   : > { %s1200_s25 = scalar_select %p1008_p6, 1, 0 }
   0xd   : > { %p1013_p8 = pnand %p587_p5, %p163_p7  ;;  %s935_s27 = smov [#allocation5]  }
   0xe   : > { %s175_s28 = sshll.u32 %s935_s27, 4  ;;  %s936_s30 = smov [#allocation7]   ;;  %s176_s28 = int_to_ptr.vmem [resolvable:$true] %s175_s28 }
   0xf   : > { %s1201_s26 = scalar_select %p1013_p8, 1, 0 }
  0x10   : > { %p726_p9 = pneg %p1013_p8  ;;  %s191_s6 = sshll.u32 %s936_s30, 4  ;;  %s192_s6 = int_to_ptr.vmem [resolvable:$true] %s191_s6 }
  0x11   : > { %s796_s7 = scalar_lea.vmem %s176_s28, 2048  ;;  %p804_p5 = scmp.lt.s32.totalorder %s176_s28, %s176_s28 }
  0x12   : > { %p1022_p11 = pnand %p726_p9, %p1194_p1  ;;  %p797_p13 = scmp.ne.s32.totalorder %s176_s28, %s796_s7 }
  0x13   : > { %p805_p7 = scmp.lt.s32.totalorder %s796_s7, %s796_s7 }
  0x14   : > { %p787_p12 = pneg %p1022_p11 }
  0x15   : > { %p806_p10 = por %p805_p7, %p804_p5 }
  0x16   : > { %p799_p0 = pnand %p797_p13, %p787_p12 }
  0x18   : > { %p800_p3 = pneg %p799_p0 }
  0x1a   : > { %p807_p9 = pnand %p806_p10, %p800_p3 }
  0x1c   : > { %810 = shalt.err (!%p807_p9)
}
  0x1d   : > { %s1195_s8 = smov 128   ;;  %s938_s9 = smov 8  }
  0x1e   : > { %729 = dma.hbm_to_vmem [thread:$0]  (!%p1022_p11), %s1189_s1, 2048, %s176_s28, [#allocation6], %s1195_s8, %s1195_s8, %s938_s9  }
  0x1f   : > { %s822_s12 = scalar_lea.vmem %s192_s6, 2048  ;;  %p830_p10 = scmp.lt.s32.totalorder %s192_s6, %s192_s6 }
  0x20   : > { %p823_p13 = scmp.ne.s32.totalorder %s192_s6, %s822_s12  ;;  %p831_p3 = scmp.lt.s32.totalorder %s822_s12, %s822_s12 }
  0x22   : > { %p825_p0 = pnand %p823_p13, %p787_p12  ;;  %p832_p7 = por %p831_p3, %p830_p10 }
  0x24   : > { %p826_p5 = pneg %p825_p0 }
  0x26   : > { %p833_p9 = pnand %p832_p7, %p826_p5 }
  0x28   : > { %836 = shalt.err (!%p833_p9)
}
  0x29   : > { %732 = dma.hbm_to_vmem [thread:$0]  (!%p1022_p11), %s1191_s3, 2048, %s192_s6, [#allocation6], %s1195_s8, %s1195_s8, %s938_s9  }
  0x2a   : > { %s1051_s15 = sadd.s32 1, %s933_s21   ;;  %s29_s16 = sadd.s32 1, %s929_s20 }
  0x2b   : > { %s26_s17 = ssub.s32 %s933_s21, %s1051_s15  ;;  %p36_p12 = scmp.ne.s32.totalorder %s929_s20, %s925_s19 }
  0x2c   : > { %p27_p13 = scmp.eq.s32.totalorder %s26_s17, 0  ;;  %p37_p0 = scmp.eq.s32.totalorder %s933_s21, 0 }
  0x2d   : > { %p1061_p5 = por %p150_p2, %p36_p12  ;;  %p743_p10 = scmp.lt.s32.totalorder %s933_s21, 2 }
  0x2e   : > { %s1067_s27 = scalar_select %p27_p13, %s929_s20, %s29_s16  }
  0x2f   : > { %s1203_s23 = scalar_select %p1061_p5, 1, 0 }
  0x30   : > { %p38_p3 = por %p37_p0, %p36_p12  ;;  %s208_s28 = sand.u32 1, %s929_s20  }
  0x31   : > { %s591_s29 = sshll.u32 %s208_s28, 4  ;;  %s606_s30 = sshll.u32 %s933_s21, 8 }
  0x32   : > { %s1074_s10 = scalar_lea.hbm %s1188_s0, %s606_s30  ;;  %s212_s11 = scalar_lea.vmem [#allocation2], %s591_s29 }
  0x33   : > { %s219_s12 = sshll.u32 %s212_s11, 4  ;;  %p1078_p2 = pnand %p743_p10, %p38_p3  ;;  %s1076_s12 = int_to_ptr.vmem [resolvable:$true] %s219_s12 }
  0x34   : > { %s1082_s14 = scalar_lea.sflag [#allocation3], %s208_s28  ;;  %s837_s16 = scalar_lea.hbm %s1074_s10, 256 }
  0x35   : > { %p838_p11 = scmp.ne.s32.totalorder %s1074_s10, %s837_s16  ;;  %p839_p7 = pneg %p1078_p2 }
  0x36   : > { %s842_s29 = scalar_lea.hbm %s1188_s0, 512  ;;  %p843_p13 = scmp.lt.s32.totalorder %s1074_s10, %s1188_s0 }
  0x37   : > { %p840_p9 = pnand %p839_p7, %p838_p11  ;;  %p844_p0 = scmp.lt.s32.totalorder %s842_s29, %s837_s16 }
  0x39   : > { %p841_p12 = pneg %p840_p9  ;;  %p845_p10 = por %p844_p0, %p843_p13 }
  0x3b   : > { %p846_p3 = pnand %p845_p10, %p841_p12 }
  0x3d   : > { %849 = shalt.err (!%p846_p3)
}
  0x3e   : > { %s850_s28 = scalar_lea.vmem %s1076_s12, 256  ;;  %s939_s11 = smov [#allocation2]  }
  0x3f   : > { %p851_p1 = scmp.ne.s32.totalorder %s1076_s12, %s850_s28  ;;  %s855_s8 = sshll.u32 %s939_s11, 4  ;;  %s856_s8 = int_to_ptr.vmem [resolvable:$false] %s855_s8 }
  0x40   : > { %s857_s17 = scalar_lea.vmem %s856_s8, 512  ;;  %p858_p9 = scmp.lt.s32.totalorder %s1076_s12, %s856_s8 }
  0x41   : > { %p853_p6 = pnand %p851_p1, %p839_p7  ;;  %p859_p5 = scmp.lt.s32.totalorder %s857_s17, %s850_s28 }
  0x43   : > { %p854_p11 = pneg %p853_p6  ;;  %p860_p4 = por %p859_p5, %p858_p9 }
  0x45   : > { %p861_p8 = pnand %p860_p4, %p854_p11 }
  0x47   : > { %864 = shalt.err (!%p861_p8)
}
  0x48   : > { %s1205_s16 = smov 128   ;;  %p1206_p1 = scmp.ne.s32.totalorder %s1201_s26, 0 }
  0x49   : > { %736 = dma.hbm_to_vmem [thread:$0]  (!%p1078_p2), %s1074_s10, 256, %s1076_s12, %s1082_s14, %s1205_s16, %s1205_s16, %s938_s9  }
  0x4a   : > { %231 = sbr.rel (%p1206_p1) target bundleno = 531 (0x213), region = 40  ;;  %s1109_s30 = sand.u32 (!%p1206_p1), 1, %s925_s19  }
  0x4b   : > { %s595_s8 = sshll.u32 (!%p1206_p1), %s1109_s30, 4  ;;  %s234_s29 = scalar_lea.sflag (!%p1206_p1), [#allocation3], %s1109_s30 }
  0x4c   : > { %s1115_s13 = scalar_lea.vmem (!%p1206_p1), [#allocation2], %s595_s8  ;;  %p1207_p4 = scmp.ne.s32.totalorder (!%p1206_p1), %s1199_s24, 0 }
  0x4f   : > { %908 = dma.done.wait (%p1207_p4), %s234_s29, 256  }
  0x50   : > { %910 = vsyncadd (%p1207_p4), %s234_s29, 4294967040  ;;  %p1208_p6 = scmp.eq.s32.totalorder %s994_s22, 0 }
  0x52   : > { %912 = dma.done.wait (%p1208_p6), [#allocation6], 4096   ;;  %p1209_p8 = pmov %p1208_p6 }
  0x53   : > { %v291_v0 = vld [vmem:[#allocation5 + $0x78] sm:$0xff]  ;;  %v290_v1 = vld [vmem:[#allocation5 + $0x70] sm:$0xff]  ;;  %v289_v2 = vld [vmem:[#allocation5 + $0x68] sm:$0xff]  ;;  %s271_s12 = scalar_lea.vmem [#allocation8], %s595_s8  ;;  %s607_s6 = sshll.u32 %s994_s22, 8 }
  0x54   : > { %914 = vsyncadd (%p1209_p8), [#allocation6], 4294963200  ;;  %644 = vmatprep.subr.mxu0 %v291_v0  ;;  %v288_v3 = vld [vmem:[#allocation5 + $0x60] sm:$0xff]  ;;  %v287_v5 = vld [vmem:[#allocation5 + $0x58] sm:$0xff]  ;;  %s494_s14 = sshll.u32 %s271_s12, 4  ;;  %s1144_s11 = scalar_lea.hbm %s1193_s5, %s607_s6  ;;  %s1139_s14 = int_to_ptr.vmem [resolvable:$true] %s494_s14 }
  0x55   : > { %645 = vmatpush3.msra.mxu0 %v291_v0  ;;  %v1126_v4 = vld [vmem:[%s1115_s13] sm:$0xff]  ;;  %v391_v6 = vld [vmem:[#allocation7 + $0x78] sm:$0xff]  ;;  %v389_v9 = vld [vmem:[#allocation7 + $0x68] sm:$0xff]  ;;  %s481_s17 = scalar_lea.sflag [#allocation4], %s1109_s30  ;;  %s865_s16 = scalar_lea.vmem %s1139_s14, 256 }
  0x56   : > { %646 = vmatprep.subr.mxu0 %v290_v1  ;;  %676 = vmatprep.mubr.f32.mxu0 %v1126_v4  ;;  %v390_v7 = vld [vmem:[#allocation7 + $0x70] sm:$0xff]  ;;  %v285_v10 = vld [vmem:[#allocation5 + $0x48] sm:$0xff]  ;;  %v388_v11 = vld [vmem:[#allocation7 + $0x60] sm:$0xff]  ;;  %p866_p5 = scmp.ne.s32.totalorder %s1139_s14, %s865_s16  ;;  %p1210_p2 = scmp.ne.s32.totalorder %s1203_s23, 0 }
  0x57   : > { %647 = vmatpush3.msra.mxu0 %v290_v1  ;;  %679 = vmatprep.subr.mxu1 %v391_v6  ;;  %v286_v8 = vld [vmem:[#allocation5 + $0x50] sm:$0xff]  ;;  %v284_v12 = vld [vmem:[#allocation5 + $0x40] sm:$0xff]  ;;  %v387_v13 = vld [vmem:[#allocation7 + $0x58] sm:$0xff]  ;;  %s940_s22 = smov [#allocation8]  }
  0x58   : > { %648 = vmatprep.subr.mxu0 %v289_v2  ;;  %680 = vmatpush3.msra.mxu1 %v391_v6  ;;  %v283_v14 = vld [vmem:[#allocation5 + $0x38] sm:$0xff]  ;;  %v386_v15 = vld [vmem:[#allocation7 + $0x50] sm:$0xff]  ;;  %v385_v17 = vld [vmem:[#allocation7 + $0x48] sm:$0xff]  ;;  %p867_p7 = pnand %p866_p5, %p1210_p2  ;;  %s869_s8 = sshll.u32 %s940_s22, 4  ;;  %s870_s8 = int_to_ptr.vmem [resolvable:$false] %s869_s8 }
  0x59   : > { %649 = vmatpush3.msra.mxu0 %v289_v2  ;;  %681 = vmatprep.subr.mxu1 %v390_v7  ;;  %v282_v16 = vld [vmem:[#allocation5 + $0x30] sm:$0xff]  ;;  %v281_v18 = vld [vmem:[#allocation5 + $0x28] sm:$0xff]  ;;  %v384_v19 = vld [vmem:[#allocation7 + $0x40] sm:$0xff]  ;;  %s871_s29 = scalar_lea.vmem %s870_s8, 512  ;;  %p872_p13 = scmp.lt.s32.totalorder %s1139_s14, %s870_s8 }
  0x5a   : > { %650 = vmatprep.subr.mxu0 %v288_v3  ;;  %682 = vmatpush3.msra.mxu1 %v390_v7  ;;  %v280_v20 = vld [vmem:[#allocation5 + $0x20] sm:$0xff]  ;;  %v383_v21 = vld [vmem:[#allocation7 + $0x38] sm:$0xff]  ;;  %v382_v23 = vld [vmem:[#allocation7 + $0x30] sm:$0xff]  ;;  %p868_p12 = pneg %p867_p7  ;;  %p873_p0 = scmp.lt.s32.totalorder %s871_s29, %s865_s16 }
  0x5b   : > { %651 = vmatpush3.msra.mxu0 %v288_v3  ;;  %683 = vmatprep.subr.mxu1 %v389_v9  ;;  %v279_v22 = vld [vmem:[#allocation5 + $0x18] sm:$0xff]  ;;  %v278_v24 = vld [vmem:[#allocation5 + $0x10] sm:$0xff]  ;;  %v381_v25 = vld [vmem:[#allocation7 + $0x28] sm:$0xff] }
  0x5c   : > { %652 = vmatprep.subr.mxu0 %v287_v5  ;;  %684 = vmatpush3.msra.mxu1 %v389_v9  ;;  %v277_v26 = vld [vmem:[#allocation5 + $0x8] sm:$0xff]  ;;  %v380_v27 = vld [vmem:[#allocation7 + $0x20] sm:$0xff]  ;;  %v379_v30 = vld [vmem:[#allocation7 + $0x18] sm:$0xff]  ;;  %p874_p10 = por %p873_p0, %p872_p13 }
  0x5d   : > { %653 = vmatpush3.msra.mxu0 %v287_v5  ;;  %685 = vmatprep.subr.mxu1 %v388_v11  ;;  %v276_v28 = vld [vmem:[#allocation5] sm:$0xff]  ;;  %v275_v29 = vld [vmem:[%s1115_s13 + $0x8] sm:$0xff]  ;;  %v378_v31 = vld [vmem:[#allocation7 + $0x10] sm:$0xff] }
  0x5e   : > { %654 = vmatprep.subr.mxu0 %v286_v8  ;;  %686 = vmatpush3.msra.mxu1 %v388_v11  ;;  %v377_v32 = vld [vmem:[#allocation7 + $0x8] sm:$0xff]  ;;  %v376_v33 = vld [vmem:[#allocation7] sm:$0xff]  ;;  %p875_p3 = pnand %p874_p10, %p868_p12 }
  0x5f   : > { %655 = vmatpush3.msra.mxu0 %v286_v8  ;;  %687 = vmatprep.subr.mxu1 %v387_v13  ;;  %v599_v34 = vld [vmem:[%s1190_s2] ss:$0 sm:$0xff] }
  0x60   : > { %656 = vmatprep.subr.mxu0 %v285_v10  ;;  %688 = vmatpush3.msra.mxu1 %v387_v13  ;;  %v600_v41 = vld [vmem:[%s1192_s4] ss:$0 sm:$0xff] }
  0x61   : > { %657 = vmatpush3.msra.mxu0 %v285_v10  ;;  %689 = vmatprep.subr.mxu1 %v386_v15 }
  0x62   : > { %658 = vmatprep.subr.mxu0 %v284_v12  ;;  %690 = vmatpush3.msra.mxu1 %v386_v15 }
  0x63   : > { %659 = vmatpush3.msra.mxu0 %v284_v12  ;;  %691 = vmatprep.subr.mxu1 %v385_v17 }
  0x64   : > { %660 = vmatprep.subr.mxu0 %v283_v14  ;;  %692 = vmatpush3.msra.mxu1 %v385_v17 }
  0x65   : > { %661 = vmatpush3.msra.mxu0 %v283_v14  ;;  %693 = vmatprep.subr.mxu1 %v384_v19 }
  0x66   : > { %662 = vmatprep.subr.mxu0 %v282_v16  ;;  %694 = vmatpush3.msra.mxu1 %v384_v19 }
  0x67   : > { %663 = vmatpush3.msra.mxu0 %v282_v16  ;;  %695 = vmatprep.subr.mxu1 %v383_v21 }
  0x68   : > { %664 = vmatprep.subr.mxu0 %v281_v18  ;;  %696 = vmatpush3.msra.mxu1 %v383_v21 }
  0x69   : > { %665 = vmatpush3.msra.mxu0 %v281_v18  ;;  %697 = vmatprep.subr.mxu1 %v382_v23 }
  0x6a   : > { %666 = vmatprep.subr.mxu0 %v280_v20  ;;  %698 = vmatpush3.msra.mxu1 %v382_v23 }
  0x6b   : > { %667 = vmatpush3.msra.mxu0 %v280_v20  ;;  %699 = vmatprep.subr.mxu1 %v381_v25 }
  0x6c   : > { %668 = vmatprep.subr.mxu0 %v279_v22  ;;  %700 = vmatpush3.msra.mxu1 %v381_v25 }
  0x6d   : > { %669 = vmatpush3.msra.mxu0 %v279_v22  ;;  %701 = vmatprep.subr.mxu1 %v380_v27 }
  0x6e   : > { %670 = vmatprep.subr.mxu0 %v278_v24  ;;  %702 = vmatpush3.msra.mxu1 %v380_v27 }
  0x6f   : > { %671 = vmatpush3.msra.mxu0 %v278_v24  ;;  %703 = vmatprep.subr.mxu1 %v379_v30 }
  0x70   : > { %672 = vmatprep.subr.mxu0 %v277_v26  ;;  %704 = vmatpush3.msra.mxu1 %v379_v30 }
  0x71   : > { %673 = vmatpush3.msra.mxu0 %v277_v26  ;;  %705 = vmatprep.subr.mxu1 %v378_v31 }
  0x72   : > { %674 = vmatprep.subr.mxu0 %v276_v28  ;;  %706 = vmatpush3.msra.mxu1 %v378_v31 }
  0x73   : > { %675 = vmatpush3.msra.mxu0 %v276_v28  ;;  %707 = vmatprep.subr.mxu1 %v377_v32 }
  0x74   : > { %677 = vmatmul.mubr.f32.vlgmr.msra.gmra.mxu0 %v275_v29  ;;  %708 = vmatpush3.msra.mxu1 %v377_v32 }
  0x75   : > { %709 = vmatprep.subr.mxu1 %v376_v33 }
  0x76   : > { %710 = vmatpush3.msra.mxu1 %v376_v33 }
 0x134   : > { %v678_v35 = vpop.f32.mrf.mxu0 }
 0x135   : > { %v371_v36 = vadd.f32 %v678_v35, %v599_v34 }
 0x136   : > { %v365_v37 = vpop.f32.mrf.mxu0 }
 0x137   : > { %v366_v38 = vadd.f32 %v599_v34, %v365_v37  ;;  %v375_v40 = vmax.f32 %v371_v36, 0.0 }
 0x139   : > { %v374_v39 = vmax.f32 %v366_v38, 0.0 }
 0x13b   : > { %711 = vmatprep.mubr.f32.mxu1 %v374_v39 }
 0x13c   : > { %712 = vmatmul.mubr.f32.vlgmr.msra.gmra.mxu1 %v375_v40 }
 0x1fc   : > { %v713_v42 = vpop.f32.mrf.mxu1 }
 0x1fd   : > { %v471_v43 = vadd.f32 %v713_v42, %v600_v41 }
 0x1fe   : > { %v465_v44 = vpop.f32.mrf.mxu1 }
 0x1ff   : > { %v475_v45 = vmax.f32 %v471_v43, 0.0  ;;  %v466_v46 = vadd.f32 %v600_v41, %v465_v44 }
 0x201   : > { %v477_v47 = vadd.f32 %v475_v45, %v275_v29  ;;  %v474_v48 = vmax.f32 %v466_v46, 0.0 }
 0x203   : > { %479 = vst [vmem:[%s271_s12 + $0x8] sm:$0xff] %v477_v47  ;;  %v476_v49 = vadd.f32 %v474_v48, %v1126_v4 }
 0x205   : > { %478 = vst [vmem:[%s271_s12] sm:$0xff] %v476_v49 }
 0x206   : > { %878 = shalt.err (!%p875_p3)
}
 0x207   : > { %s879_s13 = scalar_lea.hbm %s1144_s11, 256  ;;  %s883_s9 = scalar_lea.hbm %s1193_s5, 512 }
 0x208   : > { %p880_p11 = scmp.ne.s32.totalorder %s1144_s11, %s879_s13  ;;  %p884_p4 = scmp.lt.s32.totalorder %s1144_s11, %s1193_s5 }
 0x209   : > { %p885_p6 = scmp.lt.s32.totalorder %s883_s9, %s879_s13 }
 0x20a   : > { %p881_p9 = pnand %p880_p11, %p1210_p2 }
 0x20b   : > { %p886_p8 = por %p885_p6, %p884_p4 }
 0x20c   : > { %p882_p1 = pneg %p881_p9 }
 0x20e   : > { %p887_p5 = pnand %p886_p8, %p882_p1 }
 0x210   : > { %890 = shalt.err (!%p887_p5)
}
 0x211   : > { %s941_s6 = smov 128   ;;  %s942_s7 = smov 8  }
 0x212   : > { %724 = dma.vmem_to_hbm [thread:$0]  (%p1210_p2), %s1139_s14, 256, %s1144_s11, %s481_s17, %s941_s6, %s941_s6, %s942_s7  }
 0x213 PF: > { %s509_s28 = sand.u32 1, %s921_s18   ;;  %p1211_p7 = scmp.ne.s32.totalorder %s1200_s25, 0 }
 0x214   : > { %p1212_p12 = scmp.ge.s32.totalorder %s933_s21, 2  ;;  %s510_s16 = scalar_lea.sflag [#allocation4], %s509_s28 }
 0x216   : > { %p738_p13 = pnand %p1212_p12, %p1211_p7 }
 0x218   : > { %p739_p0 = pneg %p738_p13 }
 0x21a   : > { %916 = dma.done.wait (%p739_p0), %s510_s16, 256  }
 0x21b   : > { %918 = vsyncadd (%p739_p0), %s510_s16, 4294967040  ;;  %p19_p10 = scmp.ge.s32.totalorder %s1051_s15, 4   ;;  %s1213_s18 = smov %s925_s19 }
 0x21c   : > { %s1214_s19 = smov %s929_s20  ;;  %s1215_s20 = smov %s1067_s27 }
 0x21d   : > { %s1216_s21 = smov %s1051_s15  ;;  %21 = sbr.rel (!%p19_p10) target bundleno = 6 (0x6), region = 93 }
 0x222   :  { %515 = vsyncpa [#allocation3], 1 }
 0x223   :  { %517 = vsyncpa [#allocation3 + $0x1], 1 }
 0x224   :  { %518 = vsyncpa [#allocation6], 1 }
 0x225   :  { %519 = vsyncpa [#allocation4], 1 }
 0x226   :  { %521 = vsyncpa [#allocation4 + $0x1], 1 }

</bundles_post_ra>
